<compile_context>
chip_gen: v5e
topology: v5e:2x2
jax: 0.10.0
libtpu: 0.0.40
codegen_flags: <defaults>
</compile_context>

<pallas_src>
import jax
import jax.numpy as jnp
from jax.experimental import pallas as pl
from jax.experimental.pallas import tpu as pltpu


def _round_up(x, m):
    return ((x + m - 1) // m) * m


# ---------------------------------------------------------------------------
# Kernels
# ---------------------------------------------------------------------------

def _linear_bc_small_kernel(x_ref, w_ref, b_ref, o_ref):
    """Single full-extent block (no grid). Emits (B, out_f) directly."""
    # x: (B, D), w: (out_f, D), b: (1, out_f), o: (B, out_f)
    y = jax.lax.dot_general(
        x_ref[...], w_ref[...],
        dimension_numbers=(((1,), (1,)), ((), ())),   # x @ W^T
        preferred_element_type=jnp.float32,
    )
    o_ref[...] = (y + b_ref[...]).astype(o_ref.dtype)


def _linear_bc_tiled_kernel(x_ref, w_ref, b_ref, o_ref):
    """Streaming kernel. Emits lane-dense (out_f, tb) tiles (batch on lanes)."""
    # x: (tb, D), w: (out_f, D), b: (out_f, 1), o: (out_f, tb)
    y_t = jax.lax.dot_general(
        w_ref[...], x_ref[...],
        dimension_numbers=(((1,), (1,)), ((), ())),   # contract D -> (out_f, tb)
        preferred_element_type=jnp.float32,
    )
    o_ref[...] = (y_t + b_ref[...]).astype(o_ref.dtype)


# ---------------------------------------------------------------------------
# Tiling / VMEM planning
# ---------------------------------------------------------------------------

def _vmem_plan():
    """Return (vmem_limit_bytes, x_double_buffer_budget_bytes), per generation."""
    cap = None
    try:
        cap = getattr(pltpu.get_tpu_info(), "vmem_capacity_bytes", None)
    except Exception:
        cap = None
    if cap is None:
        cap = 64 << 20                     # be conservative (v7x-sized) if unknown
    if cap >= (96 << 20):                  # v5e / v6e: 128 MiB physical VMEM
        return 96 << 20, 40 << 20
    return 40 << 20, 18 << 20              # v7x: 64 MiB physical per TensorCore


def _pick_batch_tile(B, D, itemsize, x_budget_bytes):
    """Analytic, lane-padding-aware batch tile (multiple of 128, or full B)."""
    d_pad = _round_up(D, 128)              # VMEM pads the lane dim to 128
    per_row = d_pad * itemsize
    tb = x_budget_bytes // (2 * per_row)   # 2 = input double-buffer
    tb = max(128, (tb // 128) * 128)       # lane-align the (out_f, tb) store
    if B > 256:
        # Keep at least 2 grid steps so the "parallel" batch axis can be
        # split across both v7x TensorCores.
        tb = min(tb, _round_up(pl.cdiv(B, 2), 128))
    if tb >= B:
        return B                           # single full-extent block (legal)
    return tb


# ---------------------------------------------------------------------------
# Forward wrapper
# ---------------------------------------------------------------------------

def linear_bc_forward(x, weight, bias):
    """Pallas implementation of LinearBC.forward (single nn.Linear(D, 2))."""
    B, D = x.shape
    out_f = weight.shape[0]                # = 2
    itemsize = jnp.dtype(x.dtype).itemsize
    d_pad = _round_up(D, 128)
    vmem_limit, x_budget = _vmem_plan()

    # ---- Small-problem fast path: whole problem resident in VMEM, no grid,
    # ---- no pipeline, (B, out_f) emitted directly (no wrapper transpose).
    if _round_up(B, 8) * d_pad * itemsize <= (2 << 20):
        return pl.pallas_call(
            _linear_bc_small_kernel,
            out_shape=jax.ShapeDtypeStruct((B, out_f), x.dtype),
        )(x, weight, bias.reshape(1, out_f))

    # ---- Streaming path: pipelined batch tiles, resident W/bias, lane-dense
    # ---- (out_f, tb) output tiles. The op is purely HBM-bandwidth-bound.
    # TODO(synk): optionally cast x/W to bfloat16 here (keep f32 accumulate)
    # to halve HBM traffic if downstream accuracy allows.
    tb = _pick_batch_tile(B, D, itemsize, x_budget)
    grid = (pl.cdiv(B, tb),)               # ragged last block handled by Pallas

    y_t = pl.pallas_call(
        _linear_bc_tiled_kernel,
        out_shape=jax.ShapeDtypeStruct((out_f, B), x.dtype),
        grid=grid,
        in_specs=[
            pl.BlockSpec((tb, D), lambda i: (i, 0)),      # streamed batch tiles
            pl.BlockSpec((out_f, D), lambda i: (0, 0)),   # resident weight
            pl.BlockSpec((out_f, 1), lambda i: (0, 0)),   # resident bias
        ],
        out_specs=pl.BlockSpec((out_f, tb), lambda i: (0, i)),  # lane-dense store
        compiler_params=pltpu.CompilerParams(
            dimension_semantics=("parallel",),  # shard batch tiles across TCs
            vmem_limit_bytes=vmem_limit,        # generation-aware scoped limit
        ),
    )(x, weight, bias.reshape(out_f, 1))

    # TODO(synk): callers that can consume the lane-dense (2, B) layout (or
    # fuse this projection into x's producer kernel) should skip this transpose.
    return y_t.T


if __name__ == "__main__":
    key = jax.random.PRNGKey(0)

    # --- Shapes implied by the module: LinearBC(input_shape=32) on batch=8.
    batch, input_shape, num_labels = 8, 32, 2
    kx, kw, kb, k2 = jax.random.split(key, 4)

    # PyTorch nn.Linear-style init: uniform(-1/sqrt(D), 1/sqrt(D)).
    bound = 1.0 / jnp.sqrt(jnp.float32(input_shape))
    weight = jax.random.uniform(
        kw, (num_labels, input_shape), jnp.float32, -bound, bound)
    bias = jax.random.uniform(kb, (num_labels,), jnp.float32, -bound, bound)
    x = jax.random.normal(kx, (batch, input_shape), jnp.float32)

    out = jax.block_until_ready(linear_bc_forward(x, weight, bias))
    ref = x @ weight.T + bias
    assert out.shape == (batch, num_labels)
    assert jnp.allclose(out, ref, atol=1e-5, rtol=1e-5)

    # --- Larger smoke test exercising the tiled/pipelined path with a ragged
    # --- grid (B not a multiple of the tile, D not a multiple of 128).
    B2, D2 = 4100, 192
    kx2, kw2, kb2 = jax.random.split(k2, 3)
    bound2 = 1.0 / jnp.sqrt(jnp.float32(D2))
    w2 = jax.random.uniform(kw2, (num_labels, D2), jnp.float32, -bound2, bound2)
    b2 = jax.random.uniform(kb2, (num_labels,), jnp.float32, -bound2, bound2)
    x2 = jax.random.normal(kx2, (B2, D2), jnp.float32)

    out2 = jax.block_until_ready(linear_bc_forward(x2, w2, b2))
    ref2 = x2 @ w2.T + b2
    assert out2.shape == (B2, num_labels)
    # Loose tolerance: structural/layout check, robust to MXU precision modes.
    assert jnp.allclose(out2, ref2, atol=2e-2, rtol=2e-2)

    print("KERNEL_OK")
</pallas_src>

<mosaic_0001>
module attributes {stable_mosaic.version = 11 : i64} {
  func.func @_linear_bc_small_kernel(%arg0: memref<8x32xf32, #tpu.memory_space<vmem>>, %arg1: memref<2x32xf32, #tpu.memory_space<vmem>>, %arg2: memref<1x2xf32, #tpu.memory_space<vmem>>, %arg3: memref<8x2xf32, #tpu.memory_space<vmem>>) attributes {dimension_semantics = [], scalar_prefetch = 0 : i64, scratch_operands = 0 : i64, tpu.core_type = #tpu.core_type<tc>} {
    %c0 = arith.constant 0 : index
    %c0_0 = arith.constant 0 : index
    %0 = vector.load %arg0[%c0, %c0_0] : memref<8x32xf32, #tpu.memory_space<vmem>>, vector<8x32xf32>
    %c0_1 = arith.constant 0 : index
    %c0_2 = arith.constant 0 : index
    %1 = vector.load %arg1[%c0_1, %c0_2] : memref<2x32xf32, #tpu.memory_space<vmem>>, vector<2x32xf32>
    %cst = arith.constant dense<0.000000e+00> : vector<8x2xf32>
    %2 = tpu.matmul %0, %1, %cst {dimension_numbers = #tpu.dot_dimension_numbers<[1], [1], [0], [0], [0, 0, 1, 0], [], []>} : vector<8x32xf32>, vector<2x32xf32>, vector<8x2xf32> -> vector<8x2xf32>
    %c0_3 = arith.constant 0 : index
    %c0_4 = arith.constant 0 : index
    %3 = vector.load %arg2[%c0_3, %c0_4] : memref<1x2xf32, #tpu.memory_space<vmem>>, vector<1x2xf32>
    %4 = vector.broadcast %3 : vector<1x2xf32> to vector<8x2xf32>
    %5 = arith.addf %2, %4 : vector<8x2xf32>
    %c0_5 = arith.constant 0 : index
    %c0_6 = arith.constant 0 : index
    %6 = vector.load %arg3[%c0_5, %c0_6] : memref<8x2xf32, #tpu.memory_space<vmem>>, vector<8x2xf32>
    tpu.vector_store %arg3[%c0_5, %c0_6], %5 {strides = array<i32>} : memref<8x2xf32, #tpu.memory_space<vmem>>, vector<8x2xf32>,
    return
  }
}

</mosaic_0001>

<bundles_post_ra>
// kernel: tpu_custom_call.1
= control target key start
LH: loop header
LB: loop body
LE: loop exit
PB: predicated region body
PF: predicated region fallthrough
CT: control target
= control target key end

     0   :  { %8 = vsyncpa [#allocation3], 0  ;;  %s174_s0 = inlined_call_operand.hbm [shape: f32[8,32], index: 0, kind: input, shape index: {}]   ;;  %s175_s1 = inlined_call_operand.hbm [shape: f32[2,32], index: 1, kind: input, shape index: {}]   ;;  %s176_s2 = inlined_call_operand.vmem [shape: f32[1,2], index: 2, kind: input, shape index: {}]   ;;  %s177_s3 = inlined_call_operand.vmem [shape: f32[8,2], index: 3, kind: output, shape index: {}]  }
   0x1   :  { %s15_s14 = sshll.u32 %s174_s0, 4  ;;  %s16_s14 = int_to_ptr.hbm [resolvable:$true] %s15_s14 }
   0x2   :  { %9 = vsyncpa [#allocation5], 0  ;;  %s140_s15 = smov [#allocation2]   ;;  %s26_s19 = sshll.u32 %s175_s1, 4  ;;  %s27_s19 = int_to_ptr.hbm [resolvable:$true] %s26_s19 }
   0x3   :  { %s17_s16 = sshll.u32 %s140_s15, 4  ;;  %s141_s20 = smov [#allocation4]   ;;  %s18_s16 = int_to_ptr.vmem [resolvable:$true] %s17_s16 }
   0x4   :  { %20 = dma.hbm_to_vmem [thread:$0]  %s16_s14, 128, %s18_s16, [#allocation3]  }
   0x5   :  { %s28_s21 = sshll.u32 %s141_s20, 4  ;;  %s29_s21 = int_to_ptr.vmem [resolvable:$true] %s28_s21 }
   0x6   :  { %31 = dma.hbm_to_vmem [thread:$0]  %s27_s19, 32, %s29_s21, [#allocation5]  }
   0x7   :  { %136 = dma.done.wait [#allocation3], 128  }
   0x8   :  { %137 = vsyncadd [#allocation3], 4294967168 }
   0x9   :  { %138 = dma.done.wait [#allocation5], 32  }
   0xa   :  { %139 = vsyncadd [#allocation5], 4294967264  ;;  %vm48_vm0 = vcmask 261120   ;;  %v43_v0 = vld [vmem:[#allocation4] sm:$0x3]  ;;  %v42_v1 = vld [vmem:[#allocation2] sm:$0xff] }
   0xb   :  { %83 = vmatpush.xpose.msk.msra.mxu0 %vm48_vm0, %v43_v0  ;;  %v87_v2 = vld [vmem:[%s176_s2] ss:$0 sm:$0xff]  ;;  %vm75_vm1 = vcmask 15360  }
   0xe   :  { %84 = vmatmul.msk.f32.vlgmr.msra.gmra.mxu0 %vm48_vm0, %v42_v1 }
  0x8b   :  { %v72_v3 = vpop.f32.mrf.mxu0 }
  0x8c   :  { %v73_v4 = vadd.f32 %v87_v2, %v72_v3 }
  0x8e   :  { %76 = vst.msk [vmem:[%s177_s3] sm:$0xff] %vm75_vm1, %v73_v4 }
  0x8f   :  { %81 = vsyncpa [#allocation3], 1 }
  0x90   :  { %82 = vsyncpa [#allocation5], 1 }

</bundles_post_ra>
